<compile_context>
chip_gen: v5e
topology: v5e:2x2
jax: 0.10.0
libtpu: 0.0.40
codegen_flags: <defaults>
</compile_context>

<pallas_src>
import functools
import math

import jax
import jax.numpy as jnp
from jax import lax
from jax.experimental import pallas as pl
from jax.experimental.pallas import tpu as pltpu


def _conv_kernel(p_ref, w_ref, b_ref, o_ref, *, batch, hw):
    """Whole conv in one MXU dot.

    p_ref : (K*K*C, N*HW)  im2col patches, f32, lane-dense (HW mult. of 128)
    w_ref : (OUT, K*K*C)   2-D weight slab, f32
    b_ref : (OUT, 1)       bias column, f32
    o_ref : (N, OUT, HW)   output, f32, lane-dense
    """
    # Single fused matmul covering every tap, channel and image.
    y = jnp.dot(w_ref[...], p_ref[...], preferred_element_type=jnp.float32)
    y = y + b_ref[...]                      # (OUT, 1) column broadcast
    # Static unroll over the (tiny) batch; slices start at multiples of 128,
    # so these are full unmasked lane-aligned stores.
    for i in range(batch):
        o_ref[i] = y[:, i * hw:(i + 1) * hw]


def conv2d_pallas(x_nchw, weight, bias):
    """Conv2d, stride 1, padding 1 (PyTorch nn.Conv2d semantics), f32.

    x_nchw : (N, C, H, W) float32
    weight : (OUT, C, K, K) float32   (PyTorch layout)
    bias   : (OUT,) float32
    returns: (N, OUT, H_out, W_out) float32
    """
    N, C, H, W = x_nchw.shape
    OUT, C_w, K, K_w = weight.shape
    assert C_w == C and K_w == K
    pad = 1
    H_out = H + 2 * pad - K + 1
    W_out = W + 2 * pad - K + 1
    HW = H_out * W_out                       # 256 -> multiple of 128
    KKC = K * K * C                          # 36

    # --- wrapper glue (single small XLA fusion, ~72 KiB) --------------------
    xp = jnp.pad(x_nchw, ((0, 0), (0, 0), (pad, pad), (pad, pad)))  # (N,C,HP,WP)
    # 9 shifted tap windows, stacked so the contraction axis is ordered
    # (kh, kw, c) and the lane axis is ordered (n, y, x).
    taps = [xp[:, :, kh:kh + H_out, kw:kw + W_out]
            for kh in range(K) for kw in range(K)]          # each (N,C,Ho,Wo)
    patches = jnp.stack(taps, axis=0)                        # (K*K, N, C, Ho, Wo)
    patches = patches.transpose(0, 2, 1, 3, 4)               # (K*K, C, N, Ho, Wo)
    patches = patches.reshape(KKC, N * HW).astype(jnp.float32)

    # Weight as one 2-D slab with matching (kh, kw, c) ordering.
    w2d = jnp.transpose(weight, (0, 2, 3, 1)).reshape(OUT, KKC).astype(jnp.float32)
    b_col = bias.reshape(OUT, 1).astype(jnp.float32)

    kernel = functools.partial(_conv_kernel, batch=N, hw=HW)

    out = pl.pallas_call(
        kernel,
        out_shape=jax.ShapeDtypeStruct((N, OUT, HW), jnp.float32),
        # Single step (grid=()), full-array VMEM-resident blocks.
        in_specs=[
            pl.BlockSpec((KKC, N * HW), lambda: (0, 0)),
            pl.BlockSpec((OUT, KKC), lambda: (0, 0)),
            pl.BlockSpec((OUT, 1), lambda: (0, 0)),
        ],
        out_specs=pl.BlockSpec((N, OUT, HW), lambda: (0, 0, 0)),
    )(patches, w2d, b_col)

    # Lane-dense output is already in cropped coordinates: free reshape only.
    return out.reshape(N, OUT, H_out, W_out)


def init_classifier_params(key, in_dim, out_dim, kernel):
    """Deterministic parameter init mirroring the PyTorch module."""
    k_w, k_b = jax.random.split(key)
    fan_in = in_dim * kernel * kernel
    fan_out = out_dim * kernel * kernel
    # xavier_normal_ (gain=1): std = sqrt(2 / (fan_in + fan_out))
    std = math.sqrt(2.0 / (fan_in + fan_out))
    weight = std * jax.random.normal(
        k_w, (out_dim, in_dim, kernel, kernel), dtype=jnp.float32)
    # PyTorch default Conv2d bias init: U(-1/sqrt(fan_in), 1/sqrt(fan_in))
    bound = 1.0 / math.sqrt(fan_in)
    bias = jax.random.uniform(
        k_b, (out_dim,), minval=-bound, maxval=bound, dtype=jnp.float32)
    return weight, bias


if __name__ == "__main__":
    key = jax.random.PRNGKey(0)
    k_x, k_p = jax.random.split(key)

    N, C, H, W = 2, 4, 16, 16
    OUT, K = 8, 3

    x = jax.random.normal(k_x, (N, C, H, W), dtype=jnp.float32)
    weight, bias = init_classifier_params(k_p, C, OUT, K)

    conv_fn = jax.jit(conv2d_pallas)
    out = jax.block_until_ready(conv_fn(x, weight, bias))
    assert out.shape == (N, OUT, H, W)

    # Full-f32 reference (exact PyTorch module semantics).
    ref = lax.conv_general_dilated(
        x, weight, window_strides=(1, 1), padding=((1, 1), (1, 1)),
        dimension_numbers=("NCHW", "OIHW", "NCHW"),
    ) + bias.reshape(1, OUT, 1, 1)
    assert jnp.allclose(out, ref, atol=1e-3, rtol=1e-3)

    print("KERNEL_OK")
</pallas_src>

<mosaic_0001>
module attributes {stable_mosaic.version = 11 : i64} {
  func.func @_conv_kernel(%arg0: memref<36x512xf32, #tpu.memory_space<vmem>>, %arg1: memref<8x36xf32, #tpu.memory_space<vmem>>, %arg2: memref<8x1xf32, #tpu.memory_space<vmem>>, %arg3: memref<2x8x256xf32, #tpu.memory_space<vmem>>) attributes {dimension_semantics = [], scalar_prefetch = 0 : i64, scratch_operands = 0 : i64, tpu.core_type = #tpu.core_type<tc>} {
    %c0 = arith.constant 0 : index
    %c0_0 = arith.constant 0 : index
    %0 = vector.load %arg1[%c0, %c0_0] : memref<8x36xf32, #tpu.memory_space<vmem>>, vector<8x36xf32>
    %c0_1 = arith.constant 0 : index
    %c0_2 = arith.constant 0 : index
    %1 = vector.load %arg0[%c0_1, %c0_2] : memref<36x512xf32, #tpu.memory_space<vmem>>, vector<36x512xf32>
    %cst = arith.constant dense<0.000000e+00> : vector<8x512xf32>
    %2 = tpu.matmul %0, %1, %cst {dimension_numbers = #tpu.dot_dimension_numbers<[1], [0], [0], [1], [0, 0, 1, 1], [], []>} : vector<8x36xf32>, vector<36x512xf32>, vector<8x512xf32> -> vector<8x512xf32>
    %c0_3 = arith.constant 0 : index
    %c0_4 = arith.constant 0 : index
    %3 = vector.load %arg2[%c0_3, %c0_4] : memref<8x1xf32, #tpu.memory_space<vmem>>, vector<8x1xf32>
    %4 = vector.broadcast %3 : vector<8x1xf32> to vector<8x512xf32>
    %5 = arith.addf %2, %4 : vector<8x512xf32>
    %6 = vector.extract_strided_slice %5 {offsets = [0, 0], sizes = [8, 256], strides = [1, 1]} : vector<8x512xf32> to vector<8x256xf32>
    %c0_5 = arith.constant 0 : index
    %c0_6 = arith.constant 0 : index
    %c0_7 = arith.constant 0 : index
    %7 = vector.load %arg3[%c0_5, %c0_6, %c0_7] : memref<2x8x256xf32, #tpu.memory_space<vmem>>, vector<1x8x256xf32>
    %8 = vector.shape_cast %7 : vector<1x8x256xf32> to vector<8x256xf32>
    %9 = vector.shape_cast %6 : vector<8x256xf32> to vector<1x8x256xf32>
    tpu.vector_store %arg3[%c0_5, %c0_6, %c0_7], %9 {strides = array<i32>} : memref<2x8x256xf32, #tpu.memory_space<vmem>>, vector<1x8x256xf32>,
    %10 = vector.extract_strided_slice %5 {offsets = [0, 256], sizes = [8, 256], strides = [1, 1]} : vector<8x512xf32> to vector<8x256xf32>
    %c1 = arith.constant 1 : index
    %c0_8 = arith.constant 0 : index
    %c0_9 = arith.constant 0 : index
    %11 = vector.load %arg3[%c1, %c0_8, %c0_9] : memref<2x8x256xf32, #tpu.memory_space<vmem>>, vector<1x8x256xf32>
    %12 = vector.shape_cast %11 : vector<1x8x256xf32> to vector<8x256xf32>
    %13 = vector.shape_cast %10 : vector<8x256xf32> to vector<1x8x256xf32>
    tpu.vector_store %arg3[%c1, %c0_8, %c0_9], %13 {strides = array<i32>} : memref<2x8x256xf32, #tpu.memory_space<vmem>>, vector<1x8x256xf32>,
    return
  }
}

</mosaic_0001>

<bundles_post_ra>
// kernel: conv2d_pallas.1
= control target key start
LH: loop header
LB: loop body
LE: loop exit
PB: predicated region body
PF: predicated region fallthrough
CT: control target
= control target key end

     0   :  { %vm45_vm0 = vcmask 1043456   ;;  %v159_v3 = vmov 0   ;;  %vm41_vm1 = vcmask 293888   ;;  %s266_s0 = inlined_call_operand.vmem [shape: f32[36,512], index: 0, kind: input, shape index: {}]   ;;  %s267_s1 = inlined_call_operand.vmem [shape: f32[8,36], index: 1, kind: input, shape index: {}]   ;;  %s268_s2 = inlined_call_operand.vmem [shape: f32[8,1], index: 2, kind: input, shape index: {}]   ;;  %s269_s3 = inlined_call_operand.vmem [shape: f32[2,8,256], index: 3, kind: output, shape index: {}]  }
   0x1   :  { %v33_v0 = vld [vmem:[%s266_s0 + $0x90] sm:$0xf]  ;;  %v34_v1 = vld [vmem:[%s266_s0 + $0x98] sm:$0xf]  ;;  %158 = vset.pattern.permute.xlu0 %v159_v3  ;;  %v31_v7 = vld [vmem:[%s266_s0 + $0x80] sm:$0xf] }
   0x2   :  { %v29_v2 = vld [vmem:[%s266_s0 + $0x70] sm:$0xff]  ;;  %151 = vmatpush.msk.msra.mxu2 %vm45_vm0, %v33_v0  ;;  %153 = vmatpush.msk.msra.mxu3 %vm45_vm0, %v34_v1  ;;  %v30_v4 = vld [vmem:[%s266_s0 + $0x78] sm:$0xff]  ;;  %v32_v8 = vld [vmem:[%s266_s0 + $0x88] sm:$0xf] }
   0x3   :  { %v25_v5 = vld [vmem:[%s266_s0 + $0x50] sm:$0xff]  ;;  %v26_v6 = vld [vmem:[%s266_s0 + $0x58] sm:$0xff]  ;;  %v27_v9 = vld [vmem:[%s266_s0 + $0x60] sm:$0xff]  ;;  %147 = vmatpush.msk.msra.mxu0 %vm45_vm0, %v31_v7  ;;  %149 = vmatpush.msk.msra.mxu1 %vm45_vm0, %v32_v8 }
   0x4   :  { %110 = vmatpush.msra.mxu2 %v29_v2  ;;  %130 = vmatpush.msra.mxu3 %v30_v4  ;;  %v28_v10 = vld [vmem:[%s266_s0 + $0x68] sm:$0xff]  ;;  %v21_v11 = vld [vmem:[%s266_s0 + $0x30] sm:$0xff]  ;;  %v22_v12 = vld [vmem:[%s266_s0 + $0x38] sm:$0xff] }
   0x5   :  { %v23_v13 = vld [vmem:[%s266_s0 + $0x40] sm:$0xff]  ;;  %v24_v14 = vld [vmem:[%s266_s0 + $0x48] sm:$0xff]  ;;  %70 = vmatpush.msra.mxu0 %v27_v9  ;;  %90 = vmatpush.msra.mxu1 %v28_v10  ;;  %v17_v15 = vld [vmem:[%s266_s0 + $0x10] sm:$0xff] }
   0x6   :  { %111 = vmatpush.msra.mxu2 %v25_v5  ;;  %131 = vmatpush.msra.mxu3 %v26_v6  ;;  %v18_v16 = vld [vmem:[%s266_s0 + $0x18] sm:$0xff]  ;;  %v14_v17 = vld [vmem:[%s267_s1] sm:$0xff]  ;;  %v20_v19 = vld [vmem:[%s266_s0 + $0x28] sm:$0xff] }
   0x7   :  { %71 = vmatpush.msra.mxu0 %v23_v13  ;;  %91 = vmatpush.msra.mxu1 %v24_v14  ;;  %v19_v18 = vld [vmem:[%s266_s0 + $0x20] sm:$0xff]  ;;  %v16_v22 = vld [vmem:[%s266_s0 + $0x8] sm:$0xff] }
   0x8   :  { %112 = vmatpush.msra.mxu2 %v21_v11  ;;  %132 = vmatpush.msra.mxu3 %v22_v12  ;;  %v35_v20 = vld [vmem:[%s268_s2] sm:$0xff] }
   0x9   :  { %v15_v21 = vld [vmem:[%s266_s0] sm:$0xff]  ;;  %72 = vmatpush.msra.mxu0 %v19_v18  ;;  %92 = vmatpush.msra.mxu1 %v20_v19 }
   0xa   :  { %113 = vmatpush.msra.mxu2 %v17_v15  ;;  %133 = vmatpush.msra.mxu3 %v18_v16 }
   0xb   :  { %152 = vmatmul.msk.f32.vlgmr.msra.gmra.mxu2 %vm41_vm1, %v14_v17  ;;  %154 = vmatmul.msk.f32.vlgmr.msra.gmra.mxu3 %vm41_vm1, %v14_v17 }
   0xc   :  { %38 = vperm.xlu0 %158, %v35_v20   ;;  %73 = vmatpush.msra.mxu0 %v15_v21 }
   0xd   :  { %93 = vmatpush.msra.mxu1 %v16_v22  ;;  %148 = vmatmul.msk.f32.vlgmr.msra.gmra.mxu0 %vm41_vm1, %v14_v17 }
   0xe   :  { %150 = vmatmul.msk.f32.vlgmr.msra.gmra.mxu1 %vm41_vm1, %v14_v17 }
  0x7e   :  { %v39_v23 = vpop.permute.xlu0 %38 }
  0x8a   :  { %v75_v24 = vpop.f32.mrf.mxu0 }
  0x8b   :  { %v95_v25 = vpop.f32.mrf.mxu1  ;;  %v76_v26 = vadd.f32 %v75_v24, %v39_v23 }
  0x8c   :  { %v96_v27 = vadd.f32 %v95_v25, %v39_v23 }
  0x8d   :  { %138 = vst [vmem:[%s269_s3] sm:$0xff] %v76_v26 }
  0x8e   :  { %v115_v28 = vpop.f32.mrf.mxu2  ;;  %v135_v29 = vpop.f32.mrf.mxu3  ;;  %139 = vst [vmem:[%s269_s3 + $0x8] sm:$0xff] %v96_v27 }
  0x8f   :  { %v116_v30 = vadd.f32 %v115_v28, %v39_v23  ;;  %v136_v31 = vadd.f32 %v135_v29, %v39_v23 }
  0x91   :  { %155 = vst [vmem:[%s269_s3 + $0x10] sm:$0xff] %v116_v30 }
  0x92   :  { %156 = vst [vmem:[%s269_s3 + $0x18] sm:$0xff] %v136_v31 }

</bundles_post_ra>
